<compile_context>
chip_gen: v7x
topology: tpu7x:2x2x1
jax: 0.10.0
libtpu: 0.0.40
codegen_flags: <defaults>
</compile_context>

<pallas_src>
import math
from types import SimpleNamespace

import jax
import jax.numpy as jnp
from jax import lax
from jax.experimental import pallas as pl
from jax.experimental.pallas import tpu as pltpu


# ----------------------------------------------------------------------------
# helpers
# ----------------------------------------------------------------------------

def _tpu_vmem_capacity_bytes():
    """Physical VMEM per core (64 MiB on v7x, 128 MiB on v5e/v6e)."""
    try:
        cap = getattr(pltpu.get_tpu_info(), "vmem_capacity_bytes", None)
        if cap:
            return int(cap)
    except Exception:
        pass
    return 128 << 20


def _vmem_limit(nbytes):
    # Explicit scoped-VMEM budget with headroom, capped at 75% of physical
    # VMEM so the request never exceeds what the chip actually has.
    ceiling = (_tpu_vmem_capacity_bytes() * 3) // 4
    return int(min(max(nbytes + (4 << 20), 16 << 20), ceiling))


def _cparams(vmem_bytes, semantics=("parallel",)):
    return pltpu.CompilerParams(
        dimension_semantics=semantics,
        vmem_limit_bytes=_vmem_limit(vmem_bytes),
    )


def _pick_row_tile(rows, dtype, target=512):
    """Row tile: full extent when small, otherwise `target` rounded down to
    the sublane packing (8 for 32-bit, 16 for bf16).  Grids use pl.cdiv, so
    the last block may be partial — no divisibility requirement."""
    align = 16 if dtype == jnp.bfloat16 else 8
    if rows <= target:
        return rows
    return max(align, (target // align) * align)


def _block_diag(w, g):
    """(C, C) -> (g*C, g*C) block-diagonal replication (lane-packing trick)."""
    c = w.shape[0]
    out = jnp.zeros((g * c, g * c), w.dtype)
    for i in range(g):
        out = out.at[i * c:(i + 1) * c, i * c:(i + 1) * c].set(w)
    return out


# ----------------------------------------------------------------------------
# Pallas kernels
# ----------------------------------------------------------------------------

def _add_kernel(x_ref, y_ref, o_ref):
    o_ref[...] = x_ref[...] + y_ref[...]


def _concat_fc_kernel(x_ref, y_ref, wx_ref, wy_ref, b_ref, o_ref):
    # out = relu( cat([x, y], -1) @ W + b ),  W split as [Wx; Wy] (no concat).
    # When lane-packed, wx/wy are block-diagonal and the math is unchanged.
    acc = jnp.dot(x_ref[...], wx_ref[...], preferred_element_type=jnp.float32)
    acc = acc + jnp.dot(y_ref[...], wy_ref[...], preferred_element_type=jnp.float32)
    acc = acc + b_ref[...]                       # (1, Cp) broadcasts over (tm, Cp)
    o_ref[...] = jnp.maximum(acc, 0.0).astype(o_ref.dtype)


def _attn_kernel(x_ref, y_ref, wq_ref, wkv_ref, o_ref):
    # Scaled-dot-product attention fusion: q from x, k/v from y (fused Wkv).
    # 1/sqrt(C) is pre-folded into wq by the wrapper.
    C = wq_ref.shape[0]
    feed = jnp.bfloat16 if o_ref.dtype == jnp.bfloat16 else jnp.float32
    q = jnp.dot(x_ref[...], wq_ref[...], preferred_element_type=jnp.float32).astype(feed)
    kv = jnp.dot(y_ref[...], wkv_ref[...], preferred_element_type=jnp.float32).astype(feed)
    k = kv[:, :C]
    v = kv[:, C:]

    # scores: contract on the last dim of both operands (no k.T / XLU xpose).
    s = lax.dot_general(q, k, (((1,), (1,)), ((), ())),
                        preferred_element_type=jnp.float32)
    s = s - jnp.max(s, axis=-1, keepdims=True)        # f32 max-subtraction
    p = jnp.exp(s)
    denom = jnp.sum(p, axis=-1, keepdims=True)

    # EUP approximate reciprocal + one Newton step instead of a divide.
    inv = pl.reciprocal(denom, approx=True)
    inv = inv * (2.0 - denom * inv)

    # NOTE: with bf16 inputs, p is fed to the MXU in bf16 (f32 accumulation);
    # ~1e-2 relative error, acceptable for inference.
    out = jnp.dot(p.astype(feed), v, preferred_element_type=jnp.float32)
    o_ref[...] = (out * inv).astype(o_ref.dtype)


# ----------------------------------------------------------------------------
# fusion ops (pallas_call wrappers)
# ----------------------------------------------------------------------------

class SumFusion:
    """Elementwise fusion: out = x + y, computed lane-dense (rows, 128)."""

    def __init__(self, args):
        del args

    def __call__(self, x, y):
        shape = x.shape
        total = int(x.size)
        lanes = 128
        pad = (-total) % lanes                        # always lane-dense
        if pad:
            xf = jnp.pad(x.reshape(-1), (0, pad)).reshape(-1, lanes)
            yf = jnp.pad(y.reshape(-1), (0, pad)).reshape(-1, lanes)
        else:
            xf = x.reshape(-1, lanes)
            yf = y.reshape(-1, lanes)
        rows = xf.shape[0]

        # Big tiles so the fixed per-step overhead stays negligible even at
        # v7x HBM bandwidth (6 buffers * 2048*128*4B = 6 MiB, fits everywhere).
        tm = _pick_row_tile(rows, x.dtype, target=2048)
        spec = pl.BlockSpec((tm, lanes), lambda i: (i, 0))
        vmem = 3 * 2 * tm * lanes * x.dtype.itemsize

        out = pl.pallas_call(
            _add_kernel,
            out_shape=jax.ShapeDtypeStruct((rows, lanes), x.dtype),
            grid=(pl.cdiv(rows, tm),),
            in_specs=[spec, spec],
            out_specs=spec,
            compiler_params=_cparams(vmem),
        )(xf, yf)

        flat = out.reshape(-1)
        if pad:
            flat = flat[:total]
        return flat.reshape(shape)


class ConcatFC:
    """out = relu(Linear(2C -> C)(cat([x, y], -1)))."""

    def __init__(self, args):
        C = args.C
        self.C = C
        k1, k2, k3 = jax.random.split(jax.random.PRNGKey(1), 3)
        bound = 1.0 / math.sqrt(2 * C)                # nn.Linear(2C, C) init
        # Stored as (in, out); PyTorch checkpoints ((out, 2*in)) would need a
        # transpose + split when loading real weights.
        self.wx = jax.random.uniform(k1, (C, C), jnp.float32, -bound, bound)
        self.wy = jax.random.uniform(k2, (C, C), jnp.float32, -bound, bound)
        self.b = jax.random.uniform(k3, (1, C), jnp.float32, -bound, bound)
        self._w_cache = {}                            # (dtype, G) -> weights

    def _weights(self, act_dtype, G):
        wdt = jnp.bfloat16 if act_dtype == jnp.bfloat16 else jnp.float32
        key = (jnp.dtype(wdt).name, G)
        if key not in self._w_cache:
            if G > 1:
                wx = _block_diag(self.wx, G)          # (G*C, G*C) block-diag
                wy = _block_diag(self.wy, G)
                b = jnp.tile(self.b, (1, G))          # (1, G*C)
            else:
                wx, wy, b = self.wx, self.wy, self.b
            self._w_cache[key] = (wx.astype(wdt), wy.astype(wdt), b)
        return self._w_cache[key]

    def __call__(self, x, y):
        B, L, C = x.shape
        M = B * L                                     # fold batch into matmul M

        # Lane-packing: fold G = 128/C logical rows into one lane-dense row so
        # the matmul N dim and the output store width are 128 (unmasked vst,
        # full MXU column occupancy) without any extra HBM traffic.
        G = 1
        if C < 128 and 128 % C == 0 and M % (128 // C) == 0:
            G = 128 // C
        Cp, Mp = G * C, M // G

        xf = x.reshape(Mp, Cp)                        # free row-major view
        yf = y.reshape(Mp, Cp)
        wx, wy, b = self._weights(x.dtype, G)

        tm = _pick_row_tile(Mp, x.dtype, target=512)
        row_spec = pl.BlockSpec((tm, Cp), lambda i: (i, 0))
        w_spec = pl.BlockSpec((Cp, Cp), lambda i: (0, 0))
        b_spec = pl.BlockSpec((1, Cp), lambda i: (0, 0))
        # TODO(synk): pipeline_mode=pl.Buffered(1) on w_spec/b_spec and K-tiling
        #             for very large C on v7x (64 MiB VMEM).

        it = x.dtype.itemsize
        vmem = (3 * 2 * tm * Cp * it                  # x/y/out, double-buffered
                + 2 * 2 * Cp * Cp * wx.dtype.itemsize + 2 * Cp * 4)

        out = pl.pallas_call(
            _concat_fc_kernel,
            out_shape=jax.ShapeDtypeStruct((Mp, Cp), x.dtype),
            grid=(pl.cdiv(Mp, tm),),
            in_specs=[row_spec, row_spec, w_spec, w_spec, b_spec],
            out_specs=row_spec,
            compiler_params=_cparams(vmem),
        )(xf, yf, wx, wy, b)
        return out.reshape(B, L, C)


class ScaleDotAttn:
    """softmax((x Wq)(y Wk)^T / sqrt(C)) (y Wv), q-row tiled per batch."""

    def __init__(self, args):
        C = args.C
        self.C = C
        k1, k2, k3 = jax.random.split(jax.random.PRNGKey(2), 3)
        bound = 1.0 / math.sqrt(C)
        self.scale = 1.0 / math.sqrt(C)
        self.wq_raw = jax.random.uniform(k1, (C, C), jnp.float32, -bound, bound)
        self.wk = jax.random.uniform(k2, (C, C), jnp.float32, -bound, bound)
        self.wv = jax.random.uniform(k3, (C, C), jnp.float32, -bound, bound)
        # Fold 1/sqrt(C) into Wq once; fuse Wk/Wv into a single (C, 2C) weight
        # (half the weight DMAs / MXU pushes, 2x projection N width).
        self.wq = self.wq_raw * self.scale
        self.wkv = jnp.concatenate([self.wk, self.wv], axis=1)
        self._w_cache = {}

    def _weights(self, act_dtype):
        wdt = jnp.bfloat16 if act_dtype == jnp.bfloat16 else jnp.float32
        key = jnp.dtype(wdt).name
        if key not in self._w_cache:
            self._w_cache[key] = (self.wq.astype(wdt), self.wkv.astype(wdt))
        return self._w_cache[key]

    def __call__(self, x, y):
        B, L, C = x.shape
        wq, wkv = self._weights(x.dtype)

        # q-row tiling: score/prob buffers are (tq, L) instead of (L, L), and
        # the (B, nq) grid gives the v7x megacore something to shard.
        tq = _pick_row_tile(L, x.dtype, target=256)
        nq = pl.cdiv(L, tq)

        q_spec = pl.BlockSpec((None, tq, C), lambda b, qi: (b, qi, 0))
        kv_spec = pl.BlockSpec((None, L, C), lambda b, qi: (b, 0, 0))
        wq_spec = pl.BlockSpec((C, C), lambda b, qi: (0, 0))
        wkv_spec = pl.BlockSpec((C, 2 * C), lambda b, qi: (0, 0))
        out_spec = pl.BlockSpec((None, tq, C), lambda b, qi: (b, qi, 0))
        # TODO(synk): lane-pack the (tq, C) output when C < 128 (as in ConcatFC)
        #             and flash/KV-tile for large L (generation-aware threshold).

        it = x.dtype.itemsize
        wit = wq.dtype.itemsize
        vmem = (2 * 2 * tq * C * it                   # x/out tiles, double-buffered
                + 2 * 2 * L * C * it                  # y tile, double-buffered
                + 2 * 3 * C * C * wit                 # wq + wkv, double-buffered
                + (tq + 3 * L) * C * 4                # q / k / v intermediates
                + 2 * tq * L * 4)                     # scores + probs (f32)

        return pl.pallas_call(
            _attn_kernel,
            out_shape=jax.ShapeDtypeStruct((B, L, C), x.dtype),
            grid=(B, nq),
            in_specs=[q_spec, kv_spec, wq_spec, wkv_spec],
            out_specs=out_spec,
            compiler_params=_cparams(vmem, ("parallel", "parallel")),
        )(x, y, wq, wkv)


OPERATIONS = {
    "sum": SumFusion,
    "concat_fc": ConcatFC,
    "scale_dot_attn": ScaleDotAttn,
}


class FoundSingleModalFusionCell:
    """JAX/Pallas port of models/darts/module_found.py::FoundSingleModalFusionCell."""

    def __init__(self, args, op):
        self.op = OPERATIONS[op[1]](args)

    def __call__(self, x, y):
        return self.op(x, y)


# ----------------------------------------------------------------------------
# Pure-JAX references (correctness only)
# ----------------------------------------------------------------------------

def _ref_sum(cell, x, y):
    return x + y


def _ref_concat_fc(cell, x, y):
    op = cell.op
    acc = x @ op.wx + y @ op.wy + op.b
    return jnp.maximum(acc, 0.0)


def _ref_attn(cell, x, y):
    op = cell.op
    q, k, v = x @ op.wq_raw, y @ op.wk, y @ op.wv     # un-folded weights + explicit scale
    s = jnp.einsum("blc,bmc->blm", q, k) * op.scale
    p = jax.nn.softmax(s, axis=-1)
    return jnp.einsum("blm,bmc->blc", p, v)


if __name__ == "__main__":
    B, L, C = 2, 8, 32
    args = SimpleNamespace(C=C, L=L)

    key = jax.random.PRNGKey(0)
    kx, ky = jax.random.split(key)
    x = jax.random.normal(kx, (B, L, C), jnp.float32)
    y = jax.random.normal(ky, (B, L, C), jnp.float32)

    checks = [
        (("fusion", "sum"), _ref_sum, 1e-5),
        (("fusion", "concat_fc"), _ref_concat_fc, 1e-5),
        (("fusion", "scale_dot_attn"), _ref_attn, 1e-4),
    ]

    for op, ref_fn, tol in checks:
        cell = FoundSingleModalFusionCell(args, op)
        out = jax.block_until_ready(cell(x, y))
        ref = ref_fn(cell, x, y)
        assert out.shape == (B, L, C), f"bad shape for {op[1]}: {out.shape}"
        assert jnp.allclose(out, ref, atol=tol, rtol=tol), f"mismatch for {op[1]}"

    print("KERNEL_OK")
</pallas_src>

<mosaic_0001>
module attributes {stable_mosaic.version = 11 : i64} {
  func.func @_add_kernel(%arg0: i32, %arg1: memref<4x128xf32, #tpu.memory_space<vmem>>, %arg2: memref<4x128xf32, #tpu.memory_space<vmem>>, %arg3: memref<4x128xf32, #tpu.memory_space<vmem>>) attributes {dimension_semantics = [#tpu.dimension_semantics<parallel>], iteration_bounds = array<i64: 1>, scalar_prefetch = 0 : i64, scratch_operands = 0 : i64, tpu.core_type = #tpu.core_type<tc>, window_params = [{transform_indices = @transform_0, window_bounds = array<i64: 4, 128>}, {transform_indices = @transform_1, window_bounds = array<i64: 4, 128>}, {transform_indices = @transform_2, window_bounds = array<i64: 4, 128>}]} {
    %c0 = arith.constant 0 : index
    %c0_0 = arith.constant 0 : index
    %0 = vector.load %arg1[%c0, %c0_0] : memref<4x128xf32, #tpu.memory_space<vmem>>, vector<4x128xf32>
    %c0_1 = arith.constant 0 : index
    %c0_2 = arith.constant 0 : index
    %1 = vector.load %arg2[%c0_1, %c0_2] : memref<4x128xf32, #tpu.memory_space<vmem>>, vector<4x128xf32>
    %2 = arith.addf %0, %1 : vector<4x128xf32>
    %c0_3 = arith.constant 0 : index
    %c0_4 = arith.constant 0 : index
    %3 = vector.load %arg3[%c0_3, %c0_4] : memref<4x128xf32, #tpu.memory_space<vmem>>, vector<4x128xf32>
    tpu.vector_store %arg3[%c0_3, %c0_4], %2 {strides = array<i32>} : memref<4x128xf32, #tpu.memory_space<vmem>>, vector<4x128xf32>,
    return
  }
  func.func @transform_0(%arg0: i32) -> (i32, i32) {
    %c0_i32 = arith.constant 0 : i32
    %c0_i32_0 = arith.constant 0 : i32
    return %arg0, %c0_i32 : i32, i32
  }
  func.func @transform_1(%arg0: i32) -> (i32, i32) {
    %c0_i32 = arith.constant 0 : i32
    %c0_i32_0 = arith.constant 0 : i32
    return %arg0, %c0_i32 : i32, i32
  }
  func.func @transform_2(%arg0: i32) -> (i32, i32) {
    %c0_i32 = arith.constant 0 : i32
    %c0_i32_0 = arith.constant 0 : i32
    return %arg0, %c0_i32 : i32, i32
  }
}

</mosaic_0001>

<bundles_post_ra>
// kernel: tpu_custom_call.1
= control target key start
LH: loop header
LB: loop body
LE: loop exit
PB: predicated region body
PF: predicated region fallthrough
CT: control target
= control target key end

     0   :  { %7 = vsyncpa [#allocation3], 0  ;;  %s185_s0 = inlined_call_operand.hbm [shape: f32[4,128], index: 0, kind: input, shape index: {}]   ;;  %s186_s1 = inlined_call_operand.hbm [shape: f32[4,128], index: 1, kind: input, shape index: {}]   ;;  %s187_s2 = inlined_call_operand.hbm [shape: f32[4,128], index: 2, kind: output, shape index: {}]  }
   0x1   :  { %8 = vsyncpa [#allocation6], 0 }
   0x2   :  { %9 = vsyncpa [#allocation4], 0  ;;  %s131_s9 = smov [#allocation2]   ;;  %s132_s11 = smov [#allocation5]  }
   0x3   :  { %s16_s10 = sshll.u32 %s131_s9, 4  ;;  %s26_s12 = sshll.u32 %s132_s11, 4  ;;  %s17_s10 = int_to_ptr.vmem [resolvable:$true] %s16_s10  ;;  %s27_s12 = int_to_ptr.vmem [resolvable:$true] %s26_s12 }
   0x4   :  { %s59_s15 = scalar_lea.hbm %s185_s0, 64 }
   0x5   :  { %p60_p0 = scmp.ne.s32.totalorder %s185_s0, %s59_s15  ;;  %p63_p1 = scmp.lt.u32.totalorder %s59_s15, %s185_s0 }
   0x7   :  { %p65_p2 = pnand %p63_p1, %p60_p0 }
   0x9   :  { %68 = shalt.err (!%p65_p2)
}
   0xa   :  { %s69_s20 = scalar_lea.vmem %s17_s10, 64  ;;  %p74_p4 = scmp.lt.s32.totalorder %s17_s10, %s17_s10 }
   0xb   :  { %p70_p3 = scmp.ne.s32.totalorder %s17_s10, %s69_s20  ;;  %p75_p5 = scmp.lt.s32.totalorder %s69_s20, %s69_s20 }
   0xd   :  { %p76_p6 = por %p75_p5, %p74_p4 }
   0xf   :  { %p77_p7 = pnand %p76_p6, %p70_p3 }
  0x11   :  { %80 = shalt.err (!%p77_p7)
}
  0x12   :  { %19 = dma.hbm_to_vmem [thread:$0]  %s185_s0, 64, %s17_s10, [#allocation3]  }
  0x13   :  { %s81_s25 = scalar_lea.hbm %s186_s1, 64 }
  0x14   :  { %p82_p8 = scmp.ne.s32.totalorder %s186_s1, %s81_s25  ;;  %p85_p9 = scmp.lt.u32.totalorder %s81_s25, %s186_s1 }
  0x16   :  { %p87_p10 = pnand %p85_p9, %p82_p8 }
  0x18   :  { %90 = shalt.err (!%p87_p10)
}
  0x19   :  { %s91_s30 = scalar_lea.vmem %s27_s12, 64  ;;  %p96_p12 = scmp.lt.s32.totalorder %s27_s12, %s27_s12 }
  0x1a   :  { %p92_p11 = scmp.ne.s32.totalorder %s27_s12, %s91_s30  ;;  %p97_p13 = scmp.lt.s32.totalorder %s91_s30, %s91_s30 }
  0x1c   :  { %p98_p0 = por %p97_p13, %p96_p12 }
  0x1e   :  { %p99_p1 = pnand %p98_p0, %p92_p11 }
  0x20   :  { %102 = shalt.err (!%p99_p1)
}
  0x21   :  { %29 = dma.hbm_to_vmem [thread:$0]  %s186_s1, 64, %s27_s12, [#allocation6]  }
  0x22   :  { %125 = dma.done.wait [#allocation3], 64  }
  0x23   :  { %126 = vsyncadd [#allocation3], 4294967232 }
  0x24   :  { %127 = dma.done.wait [#allocation6], 64  }
  0x25   :  { %128 = vsyncadd [#allocation6], 4294967232  ;;  %s133_s4 = smov [#allocation7]   ;;  %v36_v0 = vld [vmem:[#allocation2] sm:$0xf] }
  0x26   :  { %s46_s5 = sshll.u32 %s133_s4, 4  ;;  %v37_v1 = vld [vmem:[#allocation5] sm:$0xf]  ;;  %s47_s5 = int_to_ptr.vmem [resolvable:$true] %s46_s5 }
  0x27   :  { %v38_v2 = vadd.f32 %v37_v1, %v36_v0  ;;  %s103_s6 = scalar_lea.vmem %s47_s5, 64  ;;  %p108_p3 = scmp.lt.s32.totalorder %s47_s5, %s47_s5 }
  0x28   :  { %p104_p2 = scmp.ne.s32.totalorder %s47_s5, %s103_s6  ;;  %p109_p4 = scmp.lt.s32.totalorder %s103_s6, %s103_s6 }
  0x29   :  { %39 = vst [vmem:[#allocation7] sm:$0xf] %v38_v2 }
  0x2a   :  { %p110_p5 = por %p109_p4, %p108_p3 }
  0x2c   :  { %p111_p6 = pnand %p110_p5, %p104_p2 }
  0x2e   :  { %114 = shalt.err (!%p111_p6)
}
  0x2f   :  { %s115_s8 = scalar_lea.hbm %s187_s2, 64 }
  0x30   :  { %p116_p7 = scmp.ne.s32.totalorder %s187_s2, %s115_s8  ;;  %p119_p8 = scmp.lt.u32.totalorder %s115_s8, %s187_s2 }
  0x32   :  { %p121_p9 = pnand %p119_p8, %p116_p7 }
  0x34   :  { %124 = shalt.err (!%p121_p9)
}
  0x35   :  { %49 = dma.vmem_to_hbm [thread:$0]  %s47_s5, 64, %s187_s2, [#allocation4]  }
  0x36   :  { %129 = dma.done.wait [#allocation4], 64  }
  0x37   :  { %130 = vsyncadd [#allocation4], 4294967232 }
  0x38   :  { %53 = vsyncpa [#allocation3], 1 }
  0x39   :  { %54 = vsyncpa [#allocation6], 1 }
  0x3a   :  { %55 = vsyncpa [#allocation4], 1 }

</bundles_post_ra>
